<compile_context>
chip_gen: v5e
topology: v5e:2x2
jax: 0.10.0
libtpu: 0.0.40
codegen_flags: <defaults>
</compile_context>

<pallas_src>
import functools

import jax
import jax.numpy as jnp
from jax.experimental import pallas as pl
from jax.experimental.pallas import tpu as pltpu


def _cam_kernel(map_scale, use_norm, inv_div, hw, map_function, *refs):
    """One (batch-tile, channel-tile) grid step of the CAM hint computation.

    refs (use_norm=True):  feat (TB,TC,HW), w (TB,TC,1), out (TB,1,HW)
    refs (use_norm=False): feat, w, bias (TB,1,1), out
    """
    if use_norm:
        feat_ref, w_ref, out_ref = refs
        bias_ref = None
    else:
        feat_ref, w_ref, bias_ref, out_ref = refs

    c = pl.program_id(1)
    last_c = pl.num_programs(1) - 1

    # Weighted partial channel sum for this tile: native-dtype load, f32 math
    # in-register, VPU broadcast-mul + sublane reduce (no M=1 MXU dot).
    x = feat_ref[...].astype(jnp.float32)                    # (TB, TC, HW)
    part = jnp.sum(x * w_ref[...], axis=1, keepdims=True)    # (TB, 1, HW) f32

    # The f32 output block is resident across the channel grid axis (its block
    # index does not depend on `c`) and doubles as the accumulator.
    @pl.when(c == 0)
    def _():
        out_ref[...] = part

    @pl.when(c != 0)
    def _():
        out_ref[...] += part

    @pl.when(c == last_c)
    def _():
        cam = out_ref[...]                                    # (TB, 1, HW)
        if use_norm:
            # PyTorch applies (cam + bias) / H before normalizing; a strictly
            # positive affine transform is exactly cancelled by
            # (x - mean) / std, so it is skipped here (std has no epsilon).
            # Two-pass unbiased variance (ddof=1): avoids E[x^2] - E[x]^2
            # cancellation.  var == 0 (constant map) still -> inf/nan, which
            # matches torch.Tensor.std() semantics.
            mean = jnp.sum(cam, axis=-1, keepdims=True) * (1.0 / hw)
            centered = cam - mean
            var = jnp.sum(centered * centered, axis=-1, keepdims=True) * (
                1.0 / (hw - 1.0))
            cam = centered * jax.lax.rsqrt(var)
        else:
            cam = (cam + bias_ref[...]) * inv_div
        z = cam * map_scale
        out = jax.nn.sigmoid(z) if map_function == "sigmoid" else jnp.tanh(z)
        out_ref[...] = out.astype(out_ref.dtype)


def _divisors(n):
    return [d for d in range(1, n + 1) if n % d == 0]


def _vmem_budget_bytes():
    """~3/4 of physical VMEM: ~48 MiB on v7x, ~96 MiB on v5e/v6e."""
    physical = 64 * 1024 * 1024  # conservative fallback (v7x size)
    try:
        info = pltpu.get_tpu_info()
        physical = int(getattr(info, "vmem_capacity_bytes", physical)) or physical
    except Exception:
        pass
    return max(32 * 1024 * 1024, (physical * 3) // 4)


def _choose_tiles(B, C, HW, itemsize, target_bytes):
    """Pick (tb, tc) batch/channel tiles.

    tb divides B (no feature-map padding) and is capped at B // 2 when B >= 2
    so the "parallel" batch axis has >= 2 steps (v7x megacore).  tc divides C
    and is a multiple of 8 (sublane dim of the (tb, tc, HW) block) unless the
    whole channel extent already fits the per-block byte target.
    """
    per_row = C * HW * itemsize
    want_tb = max(1, min(B, target_bytes // max(1, per_row)))
    if B >= 2:
        want_tb = min(want_tb, B // 2)
    tb = max(d for d in _divisors(B) if d <= want_tb)

    if tb * per_row <= target_bytes or C % 8 != 0:
        # TODO(synk): C not divisible by 8 falls back to a monolithic channel
        # block (fine for small C; ragged channel tiling not implemented).
        tc = C
    else:
        want_tc = max(8, target_bytes // max(1, tb * HW * itemsize))
        ctile = [d for d in _divisors(C) if d % 8 == 0 and d <= want_tc]
        tc = max(ctile) if ctile else C
    return tb, tc


def cam_module_forward(logit, fc_weight, label, bn_scale, bn_shift, *,
                       map_scale=4.0, use_norm=True, map_function="sigmoid",
                       max_block_bytes=None):
    """camModule.forward (eval-mode BN).

    logit:     (B, C, H, W)  any float dtype (DMA'd in its native dtype)
    fc_weight: (num_classes, C)
    label:     (B,) int
    bn_scale:  (C,) = gamma / sqrt(running_var + eps)
    bn_shift:  (C,) = beta - running_mean * bn_scale
    returns:   (B, 1, H, W) float32
    """
    B, C, H, W = logit.shape
    HW = H * W
    feat = logit.reshape(B, C, HW)                         # native dtype
    itemsize = feat.dtype.itemsize

    # Per-sample fc-row gather + BN-scale fold happen once, outside the kernel.
    w = fc_weight[label].astype(jnp.float32)               # (B, C)
    w_eff = (w * bn_scale.astype(jnp.float32)[None, :]).reshape(B, C, 1)

    vmem_budget = _vmem_budget_bytes()
    target = max(1 << 20, min(6 << 20, vmem_budget // 10))
    if max_block_bytes is not None:                        # test hook / override
        target = int(max_block_bytes)

    tb, tc = _choose_tiles(B, C, HW, itemsize, target)
    nb, nc = B // tb, C // tc

    kernel = functools.partial(_cam_kernel, float(map_scale), bool(use_norm),
                               1.0 / float(H), float(HW), map_function)

    in_arrays = [feat, w_eff]
    in_specs = [
        pl.BlockSpec((tb, tc, HW), lambda b, c: (b, c, 0)),   # feature tile
        pl.BlockSpec((tb, tc, 1), lambda b, c: (b, c, 0)),    # fused CAM weights
    ]
    if not use_norm:
        # The BN shift collapses to one scalar per sample; it only survives
        # when there is no normalization (positive affine cancels otherwise).
        bias = jnp.sum(w * bn_shift.astype(jnp.float32)[None, :],
                       axis=-1).reshape(B, 1, 1)
        in_arrays.append(bias)
        in_specs.append(pl.BlockSpec((tb, 1, 1), lambda b, c: (b, 0, 0)))

    out = pl.pallas_call(
        kernel,
        out_shape=jax.ShapeDtypeStruct((B, 1, HW), jnp.float32),
        grid=(nb, nc),
        in_specs=in_specs,
        out_specs=pl.BlockSpec((tb, 1, HW), lambda b, c: (b, 0, 0)),
        compiler_params=pltpu.CompilerParams(
            dimension_semantics=("parallel", "arbitrary"),
            vmem_limit_bytes=int(vmem_budget)),
    )(*in_arrays)

    return out.reshape(B, 1, H, W)


def _reference(logit, fc_weight, label, bn_scale, bn_shift, map_scale, use_norm):
    """Pure-JAX reference mirroring the PyTorch module (eval-mode BN)."""
    B, C, H, W = logit.shape
    x = (logit.astype(jnp.float32) * bn_scale[None, :, None, None]
         + bn_shift[None, :, None, None])
    w = fc_weight[label].astype(jnp.float32)               # (B, C)
    # hint_feature.size(1) == H for the (C, H, W) per-sample tensor in PyTorch.
    hint = jnp.sum(w[:, :, None, None] * x, axis=1, keepdims=True) / H
    if use_norm:
        mean = jnp.mean(hint, axis=(1, 2, 3), keepdims=True)
        var = jnp.sum((hint - mean) ** 2, axis=(1, 2, 3),
                      keepdims=True) / (H * W - 1)
        hint = (hint - mean) / jnp.sqrt(var)
    return jax.nn.sigmoid(hint * map_scale)


if __name__ == "__main__":
    key = jax.random.PRNGKey(0)
    k_feat, k_fc, k_lab = jax.random.split(key, 3)

    NUM_CLASSES = 10
    MAP_SCALE = 4.0
    C, H, W = 32, 16, 16

    # Deterministic eval-mode BatchNorm2d parameters.
    eps = 1e-5
    gamma = 1.0 + 0.01 * jnp.arange(C, dtype=jnp.float32)
    beta = 0.05 * jnp.arange(C, dtype=jnp.float32) - 0.5
    running_mean = 0.02 * jnp.arange(C, dtype=jnp.float32)
    running_var = 1.0 + 0.03 * jnp.arange(C, dtype=jnp.float32)
    bn_scale = gamma * jax.lax.rsqrt(running_var + eps)
    bn_shift = beta - running_mean * bn_scale

    fc_weight = jax.random.normal(k_fc, (NUM_CLASSES, C), dtype=jnp.float32) * 0.1

    def _check(batch, max_block_bytes=None):
        kf = jax.random.fold_in(k_feat, batch)
        kl = jax.random.fold_in(k_lab, batch)
        logit = jax.random.normal(kf, (batch, C, H, W), dtype=jnp.float32)
        label = jax.random.randint(kl, (batch,), 0, NUM_CLASSES, dtype=jnp.int32)
        out = cam_module_forward(logit, fc_weight, label, bn_scale, bn_shift,
                                 map_scale=MAP_SCALE, use_norm=True,
                                 map_function="sigmoid",
                                 max_block_bytes=max_block_bytes)
        out = jax.block_until_ready(out)
        ref = _reference(logit, fc_weight, label, bn_scale, bn_shift,
                         MAP_SCALE, True)
        assert out.shape == (batch, 1, H, W), out.shape
        err = float(jnp.max(jnp.abs(out - ref)))
        assert jnp.allclose(out, ref, rtol=1e-4, atol=1e-4), err

    _check(2)                              # grid (2, 1): nb=2 parallel batch steps
    _check(2, max_block_bytes=16 * 1024)   # grid (2, 2): channel-tiled reduction
    _check(3)                              # odd batch, no-padding path
    _check(16)                             # tb=8 multi-sample blocks, nb=2
    print("KERNEL_OK")
</pallas_src>

<mosaic_0001>
module attributes {stable_mosaic.version = 11 : i64} {
  func.func @_cam_kernel(%arg0: i32, %arg1: i32, %arg2: memref<1x32x256xf32, #tpu.memory_space<vmem>>, %arg3: memref<1x32x1xf32, #tpu.memory_space<vmem>>, %arg4: memref<1x1x256xf32, #tpu.memory_space<vmem>>) attributes {dimension_semantics = [#tpu.dimension_semantics<parallel>, #tpu.dimension_semantics<arbitrary>], iteration_bounds = array<i64: 2, 1>, scalar_prefetch = 0 : i64, scratch_operands = 0 : i64, tpu.core_type = #tpu.core_type<tc>, window_params = [{transform_indices = @transform_0, window_bounds = array<i64: 1, 32, 256>}, {transform_indices = @transform_1, window_bounds = array<i64: 1, 32, 1>}, {transform_indices = @transform_2, window_bounds = array<i64: 1, 1, 256>}]} {
    %c0 = arith.constant 0 : index
    %c0_0 = arith.constant 0 : index
    %c0_1 = arith.constant 0 : index
    %0 = vector.load %arg2[%c0, %c0_0, %c0_1] : memref<1x32x256xf32, #tpu.memory_space<vmem>>, vector<1x32x256xf32>
    %c0_2 = arith.constant 0 : index
    %c0_3 = arith.constant 0 : index
    %c0_4 = arith.constant 0 : index
    %1 = vector.load %arg3[%c0_2, %c0_3, %c0_4] : memref<1x32x1xf32, #tpu.memory_space<vmem>>, vector<1x32x1xf32>
    %2 = vector.broadcast %1 : vector<1x32x1xf32> to vector<1x32x256xf32>
    %3 = arith.mulf %0, %2 : vector<1x32x256xf32>
    %cst = arith.constant dense<0.000000e+00> : vector<1x256xf32>
    %4 = vector.multi_reduction <add>, %3, %cst [1] : vector<1x32x256xf32> to vector<1x256xf32>
    %5 = vector.shape_cast %4 : vector<1x256xf32> to vector<1x1x256xf32>
    %c0_i32 = arith.constant 0 : i32
    %6 = arith.cmpi eq, %arg1, %c0_i32 : i32
    %7 = arith.extui %6 : i1 to i32
    %c0_i32_5 = arith.constant 0 : i32
    %8 = arith.cmpi ne, %7, %c0_i32_5 : i32
    scf.if %8 {
      %c0_10 = arith.constant 0 : index
      %c0_11 = arith.constant 0 : index
      %c0_12 = arith.constant 0 : index
      %15 = vector.load %arg4[%c0_10, %c0_11, %c0_12] : memref<1x1x256xf32, #tpu.memory_space<vmem>>, vector<1x1x256xf32>
      tpu.vector_store %arg4[%c0_10, %c0_11, %c0_12], %5 {strides = array<i32>} : memref<1x1x256xf32, #tpu.memory_space<vmem>>, vector<1x1x256xf32>,
    } else {
    }
    %c0_i32_6 = arith.constant 0 : i32
    %9 = arith.cmpi ne, %arg1, %c0_i32_6 : i32
    %10 = arith.extui %9 : i1 to i32
    %c0_i32_7 = arith.constant 0 : i32
    %11 = arith.cmpi ne, %10, %c0_i32_7 : i32
    scf.if %11 {
      %c0_10 = arith.constant 0 : index
      %c0_11 = arith.constant 0 : index
      %c0_12 = arith.constant 0 : index
      %15 = vector.load %arg4[%c0_10, %c0_11, %c0_12] : memref<1x1x256xf32, #tpu.memory_space<vmem>>, vector<1x1x256xf32>
      %16 = arith.addf %15, %5 : vector<1x1x256xf32>
      %c0_13 = arith.constant 0 : index
      %c0_14 = arith.constant 0 : index
      %c0_15 = arith.constant 0 : index
      %17 = vector.load %arg4[%c0_13, %c0_14, %c0_15] : memref<1x1x256xf32, #tpu.memory_space<vmem>>, vector<1x1x256xf32>
      tpu.vector_store %arg4[%c0_13, %c0_14, %c0_15], %16 {strides = array<i32>} : memref<1x1x256xf32, #tpu.memory_space<vmem>>, vector<1x1x256xf32>,
    } else {
    }
    %c0_i32_8 = arith.constant 0 : i32
    %12 = arith.cmpi eq, %arg1, %c0_i32_8 : i32
    %13 = arith.extui %12 : i1 to i32
    %c0_i32_9 = arith.constant 0 : i32
    %14 = arith.cmpi ne, %13, %c0_i32_9 : i32
    scf.if %14 {
      %c0_10 = arith.constant 0 : index
      %c0_11 = arith.constant 0 : index
      %c0_12 = arith.constant 0 : index
      %15 = vector.load %arg4[%c0_10, %c0_11, %c0_12] : memref<1x1x256xf32, #tpu.memory_space<vmem>>, vector<1x1x256xf32>
      %cst_13 = arith.constant dense<0.000000e+00> : vector<1x1xf32>
      %16 = vector.multi_reduction <add>, %15, %cst_13 [2] : vector<1x1x256xf32> to vector<1x1xf32>
      %17 = vector.shape_cast %16 : vector<1x1xf32> to vector<1x1x1xf32>
      %cst_14 = arith.constant 3.906250e-03 : f32
      %18 = vector.broadcast %cst_14 : f32 to vector<1x1x1xf32>
      %19 = arith.mulf %17, %18 : vector<1x1x1xf32>
      %20 = vector.broadcast %19 : vector<1x1x1xf32> to vector<1x1x256xf32>
      %21 = arith.subf %15, %20 : vector<1x1x256xf32>
      %22 = arith.mulf %21, %21 : vector<1x1x256xf32>
      %cst_15 = arith.constant dense<0.000000e+00> : vector<1x1xf32>
      %23 = vector.multi_reduction <add>, %22, %cst_15 [2] : vector<1x1x256xf32> to vector<1x1xf32>
      %24 = vector.shape_cast %23 : vector<1x1xf32> to vector<1x1x1xf32>
      %cst_16 = arith.constant 0.00392156886 : f32
      %25 = vector.broadcast %cst_16 : f32 to vector<1x1x1xf32>
      %26 = arith.mulf %24, %25 : vector<1x1x1xf32>
      %27 = math.rsqrt %26 : vector<1x1x1xf32>
      %28 = vector.broadcast %27 : vector<1x1x1xf32> to vector<1x1x256xf32>
      %29 = arith.mulf %21, %28 : vector<1x1x256xf32>
      %cst_17 = arith.constant 4.000000e+00 : f32
      %30 = vector.broadcast %cst_17 : f32 to vector<1x1x256xf32>
      %31 = arith.mulf %29, %30 : vector<1x1x256xf32>
      %32 = arith.negf %31 : vector<1x1x256xf32>
      %33 = math.exp %32 : vector<1x1x256xf32>
      %cst_18 = arith.constant 1.000000e+00 : f32
      %34 = vector.broadcast %cst_18 : f32 to vector<1x1x256xf32>
      %35 = arith.addf %34, %33 : vector<1x1x256xf32>
      %36 = arith.divf %34, %35 : vector<1x1x256xf32>
      %c0_19 = arith.constant 0 : index
      %c0_20 = arith.constant 0 : index
      %c0_21 = arith.constant 0 : index
      %37 = vector.load %arg4[%c0_19, %c0_20, %c0_21] : memref<1x1x256xf32, #tpu.memory_space<vmem>>, vector<1x1x256xf32>
      tpu.vector_store %arg4[%c0_19, %c0_20, %c0_21], %36 {strides = array<i32>} : memref<1x1x256xf32, #tpu.memory_space<vmem>>, vector<1x1x256xf32>,
    } else {
    }
    return
  }
  func.func @transform_0(%arg0: i32, %arg1: i32) -> (i32, i32, i32) {
    %c0_i32 = arith.constant 0 : i32
    %c0_i32_0 = arith.constant 0 : i32
    return %arg0, %arg1, %c0_i32 : i32, i32, i32
  }
  func.func @transform_1(%arg0: i32, %arg1: i32) -> (i32, i32, i32) {
    %c0_i32 = arith.constant 0 : i32
    %c0_i32_0 = arith.constant 0 : i32
    return %arg0, %arg1, %c0_i32 : i32, i32, i32
  }
  func.func @transform_2(%arg0: i32, %arg1: i32) -> (i32, i32, i32) {
    %c0_i32 = arith.constant 0 : i32
    %c0_i32_0 = arith.constant 0 : i32
    %c0_i32_1 = arith.constant 0 : i32
    return %arg0, %c0_i32, %c0_i32_0 : i32, i32, i32
  }
}

</mosaic_0001>

<bundles_post_ra>
// kernel: tpu_custom_call.1
= control target key start
LH: loop header
LB: loop body
LE: loop exit
PB: predicated region body
PF: predicated region fallthrough
CT: control target
= control target key end

     0   :  { %7 = vsyncpa [#allocation3], 0  ;;  %s873_s0 = inlined_call_operand.hbm [shape: f32[2,32,256], index: 0, kind: input, shape index: {}]   ;;  %s874_s1 = inlined_call_operand.vmem [shape: f32[2,32,1], index: 1, kind: input, shape index: {}]   ;;  %s875_s2 = inlined_call_operand.hbm [shape: f32[2,1,256], index: 2, kind: output, shape index: {}]  }
   0x1   :  { %9 = vsyncpa [#allocation3 + $0x1], 0 }
   0x2   :  { %10 = vsyncpa [#allocation4], 0 }
   0x3   :  { %12 = vsyncpa [#allocation4 + $0x1], 0  ;;  %s718_s9 = smov 0   ;;  %s720_s10 = smov 0  }
   0x4   :  { %s722_s11 = smov 0   ;;  %s724_s12 = smov 0  }
   0x5   :  { %s726_s13 = smov 0   ;;  %s728_s14 = smov 0  }
   0x6 LB: > { %s494_s15 = sadd.s32 4294967295, %s698_s14   ;;  %s495_s16 = sadd.s32 4294967294, %s698_s14   ;;  %s698_s14 = sphi %s728_s14, %s18_s14   ;;  %s694_s13 = sphi %s726_s13, %s886_s13   ;;  %s690_s12 = sphi %s724_s12, %s885_s12   ;;  %s686_s11 = sphi %s722_s11, %s884_s11   ;;  %s682_s10 = sphi %s720_s10, %s883_s10   ;;  %s678_s9 = sphi %s718_s9, %s882_s9  }
   0x7   : > { %s30_s17 = sadd.s32 1, %s694_s13  ;;  %s39_s18 = sadd.s32 1, %s686_s11 }
   0x8   : > { %p32_p0 = scmp.ge.s32.totalorder %s30_s17, 2  ;;  %p46_p1 = scmp.ne.s32.totalorder %s686_s11, %s682_s10 }
   0x9   : > { %p47_p2 = scmp.eq.s32.totalorder %s698_s14, 0  ;;  %p52_p3 = scmp.ne.s32.totalorder %s682_s10, %s678_s9 }
   0xa   : > { %s888_s17 = smov (%p32_p0, %s30_s17), 0  ;;  %p53_p5 = scmp.eq.s32.totalorder %s494_s15, 0 }
   0xb   : > { %p759_p4 = por %p47_p2, %p46_p1  ;;  %s34_s20 = ssub.s32 %s694_s13, %s888_s17 }
   0xc   : > { %p104_p6 = scmp.eq.s32.totalorder %s494_s15, 1  ;;  %p37_p7 = scmp.eq.s32.totalorder %s34_s20, 0 }
   0xd   : > { %p765_p8 = por %p53_p5, %p52_p3  ;;  %p110_p10 = scmp.eq.s32.totalorder %s495_s16, 1 }
   0xe   : > { %p769_p9 = por %p104_p6, %p46_p1  ;;  %p497_p12 = scmp.ge.s32.totalorder %s698_s14, 2 }
   0xf   : > { %s774_s23 = scalar_select %p37_p7, %s686_s11, %s39_s18  }
  0x10   : > { %p776_p11 = por %p110_p10, %p52_p3  ;;  %p525_p13 = scmp.lt.s32.totalorder %s698_s14, 2 }
  0x11   : > { %s130_s25 = sand.u32 1, %s686_s11   ;;  %s511_s27 = sshll.u32 %s694_s13, 6 }
  0x12   : > { %s498_s26 = sshll.u32 %s130_s25, 6  ;;  %s142_s30 = scalar_lea.hbm %s873_s0, %s511_s27 }
  0x13   : > { %s134_s3 = scalar_lea.vmem [#allocation2], %s498_s26  ;;  %s143_s5 = sshll.u32 %s142_s30, 4  ;;  %s144_s5 = int_to_ptr.hbm [resolvable:$true] %s143_s5 }
  0x14   : > { %s145_s4 = sshll.u32 %s134_s3, 4  ;;  %p518_p0 = pnand %p525_p13, %p759_p4  ;;  %s146_s4 = int_to_ptr.vmem [resolvable:$true] %s145_s4 }
  0x15   : > { %p501_p1 = scmp.ge.s32.totalorder %s698_s14, 1  ;;  %s131_s6 = scalar_lea.sflag [#allocation3], %s130_s25 }
  0x16   : > { %s700_s7 = smov 256   ;;  %s701_s8 = smov 16  }
  0x17   : > { %520 = dma.hbm_to_vmem [thread:$0]  (!%p518_p0), %s144_s5, 1024, %s146_s4, %s131_s6, %s700_s7, %s700_s7, %s701_s8  }
  0x18   : > { %p166_p2 = scmp.lt.s32.totalorder %s698_s14, 3 }
  0x1a   : > { %p167_p3 = pnand %p501_p1, %p166_p2 }
  0x1b   : > { %s792_s15 = sand.u32 (!%p167_p3), 1, %s682_s10  }
  0x1c   : > { %170 = sbr.rel (%p167_p3) target bundleno = 502 (0x1f6), region = 28  ;;  %s502_s16 = sshll.u32 (!%p167_p3), %s792_s15, 6 }
  0x1d   : > { %s173_s18 = scalar_lea.sflag (!%p167_p3), [#allocation3], %s792_s15  ;;  %s796_s20 = scalar_lea.vmem (!%p167_p3), [#allocation2], %s502_s16 }
  0x21   : > { %669 = dma.done.wait (%p765_p8), %s173_s18, 1024  }
  0x22   : > { %671 = vsyncadd (%p765_p8), %s173_s18, 4294966272  ;;  %p209_p4 = scmp.lt.s32.totalorder %s690_s12, 1  ;;  %v702_v0 = vmov 0   ;;  %v218_v7 = vld [vmem:[%s796_s20] sm:$0xff]  ;;  %v219_v8 = vld [vmem:[%s796_s20 + $0x8] sm:$0xff]  ;;  %v286_v41 = vlaneseq  ;;  %s503_s21 = sshll.u32 %s792_s15, 1 }
  0x23   : > { %579 = vset.pattern.permute.xlu1 %v702_v0  ;;  %578 = vset.pattern.permute.xlu0 %v702_v0  ;;  %v220_v9 = vld [vmem:[%s796_s20 + $0x10] sm:$0xff]  ;;  %v221_v10 = vld [vmem:[%s796_s20 + $0x18] sm:$0xff]  ;;  %v222_v11 = vld [vmem:[%s796_s20 + $0x20] sm:$0xff]  ;;  %vm283_vm0 = vcmask 1040384   ;;  %s821_s29 = scalar_lea.vmem [#allocation5], %s503_s21  ;;  %s508_s30 = sshll.u32 %s690_s12, 1 }
  0x24   : > { %s210_s19 = scalar_select %p209_p4, %s690_s12, 1  ;;  %v223_v12 = vld [vmem:[%s796_s20 + $0x28] sm:$0xff]  ;;  %v224_v19 = vld [vmem:[%s796_s20 + $0x30] sm:$0xff]  ;;  %v225_v20 = vld [vmem:[%s796_s20 + $0x38] sm:$0xff]  ;;  %vm816_vm1 = vcmp.lt.s32.totalorder %v286_v41, 256 }
  0x25   : > { %s390_s5 = scalar_lea.hbm %s875_s2, %s508_s30  ;;  %s392_s6 = sshll.u32 %s821_s29, 4  ;;  %s393_s6 = int_to_ptr.vmem [resolvable:$true] %s392_s6 }
  0x26   : > { %s512_s25 = sshll.u32 %s210_s19, 5  ;;  %s394_s7 = sshll.u32 %s390_s5, 4  ;;  %s395_s7 = int_to_ptr.hbm [resolvable:$true] %s394_s7 }
  0x27   : > { %s216_s28 = scalar_lea.vmem %s874_s1, %s512_s25  ;;  %s380_s12 = scalar_lea.sflag [#allocation4], %s792_s15 }
  0x28   : > { %v228_v1 = vld [vmem:[%s216_s28 + $0x10] sm:$0xff]  ;;  %v226_v2 = vld [vmem:[%s216_s28] sm:$0xff]  ;;  %v229_v3 = vld [vmem:[%s216_s28 + $0x18] sm:$0xff]  ;;  %s630_s8 = sshra.s32 %s395_s7, 4  ;;  %s636_s19 = scalar_lea.hbm %s875_s2, 4  ;;  %s631_s8 = int_to_ptr.hbm [resolvable:$true] %s630_s8 }
  0x29   : > { %242 = vperm.xlu1 %579, %v228_v1   ;;  %232 = vperm.xlu0 %578, %v226_v2   ;;  %v227_v4 = vld [vmem:[%s216_s28 + $0x8] sm:$0xff]  ;;  %s632_s16 = scalar_lea.hbm %s631_s8, 2  ;;  %p637_p8 = scmp.lt.s32.totalorder %s631_s8, %s875_s2 }
  0x2a   : > { %p633_p5 = scmp.ne.s32.totalorder %s631_s8, %s632_s16  ;;  %p638_p10 = scmp.lt.s32.totalorder %s636_s19, %s632_s16 }
  0x2c   : > { %p634_p6 = pnand %p633_p5, %p769_p9  ;;  %p639_p13 = por %p638_p10, %p637_p8 }
  0x2e   : > { %p635_p7 = pneg %p634_p6 }
  0x30   : > { %p640_p0 = pnand %p639_p13, %p635_p7 }
  0x31   : > { %247 = vperm.xlu1 %579, %v229_v3   ;;  %237 = vperm.xlu0 %578, %v227_v4  }
  0x9b   : > { %v243_v5 = vpop.permute.xlu1 %242  ;;  %v233_v6 = vpop.permute.xlu0 %232 }
  0x9c   : > { %v250_v14 = vmul.f32 %v233_v6, %v218_v7  ;;  %v251_v15 = vmul.f32 %v233_v6, %v219_v8  ;;  %v254_v21 = vmul.f32 %v243_v5, %v222_v11  ;;  %v255_v22 = vmul.f32 %v243_v5, %v223_v12 }
  0xa3   : > { %v238_v13 = vpop.permute.xlu0 %237  ;;  %v248_v18 = vpop.permute.xlu1 %247 }
  0xa4   : > { %v252_v16 = vmul.f32 %v238_v13, %v220_v9  ;;  %v253_v17 = vmul.f32 %v238_v13, %v221_v10  ;;  %v256_v25 = vmul.f32 %v248_v18, %v224_v19  ;;  %v257_v26 = vmul.f32 %v248_v18, %v225_v20 }
  0xa6   : > { %v258_v23 = vadd.f32 %v252_v16, %v250_v14  ;;  %v267_v24 = vadd.f32 %v253_v17, %v251_v15 }
  0xa8   : > { %v259_v27 = vadd.f32 %v258_v23, %v254_v21  ;;  %v268_v28 = vadd.f32 %v267_v24, %v255_v22 }
  0xaa   : > { %v260_v29 = vadd.f32 %v259_v27, %v256_v25  ;;  %v269_v30 = vadd.f32 %v268_v28, %v257_v26 }
  0xac   : > { %v261_v31 = vrot.slane %v260_v29, 4  ;;  %v270_v32 = vrot.slane %v269_v30, 4 }
  0xae   : > { %v262_v33 = vadd.f32 %v261_v31, %v260_v29  ;;  %v271_v34 = vadd.f32 %v270_v32, %v269_v30 }
  0xb0   : > { %v263_v35 = vrot.slane %v262_v33, 2  ;;  %v272_v36 = vrot.slane %v271_v34, 2 }
  0xb2   : > { %v264_v37 = vadd.f32 %v263_v35, %v262_v33  ;;  %v273_v38 = vadd.f32 %v272_v36, %v271_v34 }
  0xb4   : > { %v265_v39 = vrot.slane %v264_v37, 1  ;;  %v274_v40 = vrot.slane %v273_v38, 1 }
  0xb6   : > { %v275_v42 = vadd.f32 %v274_v40, %v273_v38  ;;  %v266_v43 = vadd.f32 %v265_v39, %v264_v37 }
  0xb8   : > { %v282_v44 = vrot.slane %v275_v42, 7 }
  0xba   : > { %v284_v46 = vsel %vm283_vm0, %v266_v43, %v282_v44 }
  0xbb   : > { %290 = vst.msk [vmem:[%s821_s29] sm:$0x3] %vm816_vm1, %v284_v46 }
  0xc2   : > { %v311_v47 = vld [vmem:[%s821_s29] sm:$0x3] }
  0xc3   : > { %v313_v48 = vperm.slane %v311_v47, 0  ;;  %v314_v49 = vperm.slane %v311_v47, 1 }
  0xc5   : > { %v318_v50 = vsel %vm283_vm0, %v313_v48, 0.0  ;;  %v319_v51 = vsel %vm283_vm0, %v314_v49, 0.0 }
  0xc6   : > { %v320_v52 = vadd.f32 %v319_v51, %v318_v50 }
  0xc8   : > { %321 = vadd.xlane.f32.xlu2 %v320_v52 }
 0x13b   : > { %v322_v53 = vpop.xlane.xlu2 %321 }
 0x13c   : > { %v323_v54 = vmul.f32 0.00390625, %v322_v53 }
 0x13e   : > { %v325_v55 = vperm.slane %v323_v54, 0 }
 0x140   : > { %v327_v56 = vsub.f32 %v311_v47, %v325_v55 }
 0x142   : > { %v328_v57 = vmul.f32 %v327_v56, %v327_v56 }
 0x144   : > { %v330_v58 = vperm.slane %v328_v57, 0  ;;  %v331_v59 = vperm.slane %v328_v57, 1 }
 0x146   : > { %v334_v60 = vsel %vm283_vm0, %v330_v58, 0.0  ;;  %v335_v61 = vsel %vm283_vm0, %v331_v59, 0.0 }
 0x147   : > { %v336_v62 = vadd.f32 %v335_v61, %v334_v60 }
 0x149   : > { %337 = vadd.xlane.f32.xlu2 %v336_v62 }
 0x1bc   : > { %v338_v63 = vpop.xlane.xlu2 %337 }
 0x1bd   : > { %v339_v0 = vmul.f32 0.003921569, %v338_v63 }
 0x1bf   : > { %580 = vrsqrt.f32 %v339_v0  ;;  %vm346_vm3 = vweird.f32 %v339_v0 }
 0x1c5   : > { %v581_v1 = vpop.eup %580 }
 0x1c6   : > { %v341_v2 = vmul.f32 %v581_v1, %v339_v0  ;;  %vm347_vm2 = vweird.f32 %v581_v1 }
 0x1c7   : > { %vm348_vm4 = vmor %vm346_vm3, %vm347_vm2 }
 0x1c8   : > { %v342_v3 = vmul.f32 %v581_v1, %v341_v2 }
 0x1ca   : > { %v343_v4 = vmul.f32 0.5, %v342_v3 }
 0x1cc   : > { %v344_v5 = vsub.f32 1.5, %v343_v4 }
 0x1ce   : > { %v345_v6 = vmul.f32 %v581_v1, %v344_v5 }
 0x1d0   : > { %v349_v7 = vsel %vm348_vm4, %v581_v1, %v345_v6 }
 0x1d1   : > { %v351_v8 = vperm.slane %v349_v7, 0 }
 0x1d3   : > { %v353_v9 = vmul.f32 %v351_v8, %v327_v56 }
 0x1d5   : > { %v506_v10 = vmul.f32 -4.0, %v353_v9 }
 0x1d7   : > { %v356_v11 = vmul.f32 1.442695, %v506_v10 }
 0x1d9   : > { %582 = vpow2.f32 %v356_v11 }
 0x1df   : > { %v583_v12 = vpop.eup %582 }
 0x1e0   : > { %v358_v13 = vadd.f32 1.0, %v583_v12 }
 0x1e2   : > { %584 = vrcp.f32 %v358_v13  ;;  %v370_v17 = vand.u32 2147483648, %v358_v13  ;;  %v368_v19 = vand.u32 2147483647, %v358_v13  ;;  %vm364_vm6 = vweird.f32 %v358_v13 }
 0x1e4   : > { %v371_v21 = vor.u32 1.1754944e-38, %v370_v17  ;;  %vm369_vm8 = vcmp.eq.f32.partialorder %v368_v19, 8.507059e+37 }
 0x1e8   : > { %v585_v14 = vpop.eup %584 }
 0x1e9   : > { %v360_v15 = vmul.f32 %v585_v14, %v358_v13  ;;  %vm365_vm5 = vweird.f32 %v585_v14 }
 0x1ea   : > { %vm366_vm7 = vmor %vm364_vm6, %vm365_vm5 }
 0x1eb   : > { %v361_v16 = vsub.f32 1.0, %v360_v15 }
 0x1ed   : > { %v362_v18 = vmul.f32 %v585_v14, %v361_v16 }
 0x1ef   : > { %v363_v20 = vadd.f32 %v585_v14, %v362_v18 }
 0x1f1   : > { %v367_v22 = vsel %vm366_vm7, %v585_v14, %v363_v20 }
 0x1f2   : > { %v372_v23 = vsel %vm369_vm8, %v371_v21, %v367_v22 }
 0x1f3   : > { %378 = vst.msk [vmem:[%s821_s29] sm:$0x3] %vm816_vm1, %v372_v23 }
 0x1f4   : > { %643 = shalt.err (!%p640_p0)
}
 0x1f5   : > { %515 = dma.vmem_to_hbm [thread:$0]  (%p769_p9), %s393_s6, 32, %s395_s7, %s380_s12  }
 0x1f6 PF: > { %s406_s15 = sand.u32 1, %s678_s9   ;;  %p522_p1 = pnand %p497_p12, %p776_p11 }
 0x1f7   : > { %s407_s27 = scalar_lea.sflag [#allocation4], %s406_s15 }
 0x1f8   : > { %p523_p2 = pneg %p522_p1 }
 0x1fa   : > { %673 = dma.done.wait (%p523_p2), %s407_s27, 32  }
 0x1fb   : > { %675 = vsyncadd (%p523_p2), %s407_s27, 4294967264  ;;  %s18_s14 = sadd.s32 1, %s698_s14   ;;  %s882_s9 = smov %s682_s10 }
 0x1fc   : > { %p15_p3 = scmp.ge.s32.totalorder %s18_s14, 4   ;;  %s883_s10 = smov %s686_s11 }
 0x1fd   : > { %s884_s11 = smov %s774_s23  ;;  %s885_s12 = smov %s694_s13 }
 0x1fe   : > { %s886_s13 = smov %s888_s17  ;;  %17 = sbr.rel (!%p15_p3) target bundleno = 6 (0x6), region = 88 }
 0x203   :  { %413 = vsyncpa [#allocation3], 1 }
 0x204   :  { %415 = vsyncpa [#allocation3 + $0x1], 1 }
 0x205   :  { %416 = vsyncpa [#allocation4], 1 }
 0x206   :  { %418 = vsyncpa [#allocation4 + $0x1], 1 }

</bundles_post_ra>
